<compile_context>
chip_gen: v7x
topology: tpu7x:2x2x1
jax: 0.10.0
libtpu: 0.0.40
codegen_flags: <defaults>
</compile_context>

<pallas_src>
import functools
import math

import jax
import jax.numpy as jnp
from jax.experimental import pallas as pl
from jax.experimental.pallas import tpu as pltpu


def _label_smooth_loss_kernel(logits_ref, tgt_ref, out_ref, *,
                              vocab_size, seq_len, t_tile,
                              conf, low, c_const, pad_token):
    """Grid step (b, t): one (V, TT) logits tile, classes on sublanes."""
    t = pl.program_id(1)

    # Per-batch (1, TT) partial-sum block stays resident across the t axis.
    @pl.when(t == 0)
    def _():
        out_ref[...] = jnp.zeros_like(out_ref)

    x = logits_ref[...].astype(jnp.float32)        # (V, TT)
    tgt = tgt_ref[...]                             # (1, TT) int32 labels

    # log-softmax statistics over the class (sublane) axis, computed on the
    # raw logits; the max-shift is folded in analytically per column, so no
    # (V, TT) "shifted" temporary is materialized.
    m = jnp.max(x, axis=0, keepdims=True)                           # (1, TT)
    sum_x = jnp.sum(x, axis=0, keepdims=True)                       # (1, TT)
    lse = jnp.log(jnp.sum(jnp.exp(x - m), axis=0, keepdims=True))   # (1, TT)

    # Logits at the target class: (V,1) class iota vs (1,TT) targets -> masked
    # sublane sum (no full (V,TT) int32 iota is materialized).
    cls_ids = jax.lax.broadcasted_iota(jnp.int32, (vocab_size, 1), 0)
    x_tgt = jnp.sum(jnp.where(cls_ids == tgt, x, 0.0),
                    axis=0, keepdims=True)                          # (1, TT)

    #   logp[v]      = x[v] - m - lse
    #   sum_v logp   = sum_x - V*(m + lse)
    #   logp[target] = x_tgt - m - lse
    sum_logp = sum_x - jnp.float32(vocab_size) * (m + lse)
    logp_tgt = x_tgt - m - lse

    # Closed-form smoothed one-hot KL divergence per column.
    col_kl = (jnp.float32(c_const)
              - jnp.float32(conf - low) * logp_tgt
              - jnp.float32(low) * sum_logp)                        # (1, TT)

    # Mask pad-token columns and, on a partial last tile, out-of-range columns
    # whose VMEM contents are undefined.
    lane_ids = jax.lax.broadcasted_iota(jnp.int32, tgt.shape, 1)    # (1, TT)
    in_range = lane_ids < (jnp.int32(seq_len) - t * jnp.int32(t_tile))
    valid = jnp.logical_and(in_range, tgt != jnp.int32(pad_token))

    out_ref[...] += jnp.where(valid, col_kl, jnp.float32(0.0))


def _pick_t_tile(T, V, budget_bytes=4 * 1024 * 1024):
    """Sequence tile TT: multiple of 128 with V*TT*4 (f32 working set) <= ~4 MiB."""
    max_tt = (budget_bytes // (V * 4)) // 128 * 128
    # TODO(synk): tile the class axis with an online log-sum-exp when even a
    # single (V, 128) column block exceeds VMEM (very large vocabularies).
    max_tt = max(max_tt, 128)
    if T <= max_tt:
        return T
    return max_tt


def _vmem_limit_bytes(V, TT, in_itemsize):
    """Generation-aware VMEM request: cover the working set, never most of v7x."""
    try:
        cap = int(getattr(pltpu.get_tpu_info(), "vmem_capacity_bytes",
                          64 * 1024 * 1024))
    except Exception:
        cap = 64 * 1024 * 1024
    block_in = V * TT * in_itemsize      # double-buffered input tile
    block_f32 = V * TT * 4               # in-kernel f32 cast + fused exp pass
    need = 2 * block_in + 2 * block_f32 + 16 * TT * 4 + (4 << 20)
    return int(min(max(need, 16 * 1024 * 1024), (cap * 3) // 4))


def label_smooth_loss(output, target, *, smoothing, pad_token, t_tile=None):
    """Matches LabelSmoothLoss(smoothing, pad_token).forward(output, target)."""
    assert 0.0 <= smoothing < 1.0
    B = output.shape[0]
    V = output.shape[1]

    # Collapse all trailing (non-class) axes into one sequence axis, keeping
    # logits in their native (B, V, T) layout (no HBM transpose for the common
    # 2-D / 3-D cases).
    if output.ndim == 2:
        logits = output[:, :, None]
    elif output.ndim == 3:
        logits = output
    else:
        # Match _keep_one's transpose(1, -1) trailing-dim ordering.
        logits = jnp.moveaxis(output, -1, 2).reshape(B, V, -1)
    T = logits.shape[2]

    tgt = jnp.reshape(target, (B, 1, T)).astype(jnp.int32)

    itemsize = jnp.dtype(logits.dtype).itemsize
    TT = int(t_tile) if t_tile is not None else _pick_t_tile(T, V)
    num_t = pl.cdiv(T, TT)

    conf = 1.0 - float(smoothing)
    low = float(smoothing) / (V - 1) if V > 1 else 0.0
    c_const = conf * math.log(conf)
    if low > 0.0:
        c_const += (V - 1) * low * math.log(low)

    kernel = functools.partial(
        _label_smooth_loss_kernel,
        vocab_size=int(V), seq_len=int(T), t_tile=int(TT),
        conf=conf, low=low, c_const=c_const, pad_token=int(pad_token))

    cost = pl.CostEstimate(
        flops=int(6 * B * T * V),
        transcendentals=int(B * T * V + B * T),
        bytes_accessed=int(B * V * T * itemsize + B * T * 4 + B * TT * 4))

    partials = pl.pallas_call(
        kernel,
        out_shape=jax.ShapeDtypeStruct((B, 1, TT), jnp.float32),
        grid=(B, num_t),
        in_specs=[
            # (V, TT) logits tile: class axis on sublanes, sequence on lanes.
            pl.BlockSpec((None, V, TT), lambda b, t: (b, 0, t)),
            # (1, TT) target tile, broadcast over the class axis in-kernel.
            pl.BlockSpec((None, 1, TT), lambda b, t: (b, 0, t)),
        ],
        # Per-batch (1, TT) partial sums stay resident across the reduction
        # (t) axis; the batch axis can therefore run megacore-parallel.
        out_specs=pl.BlockSpec((None, 1, TT), lambda b, t: (b, 0, 0)),
        compiler_params=pltpu.CompilerParams(
            dimension_semantics=("parallel", "arbitrary"),
            vmem_limit_bytes=_vmem_limit_bytes(V, TT, itemsize)),
        cost_estimate=cost,
    )(logits, tgt)

    # Tiny (B, 1, TT) reduction + batch normalization done in plain JAX.
    return jnp.sum(partials) / jnp.float32(B)


def _reference(output, target, *, smoothing, pad_token):
    """Pure-JAX reference mirroring the PyTorch forward, for a sanity check."""
    B = output.shape[0]
    V = output.shape[1]
    logits = jnp.swapaxes(output, 1, -1).reshape(-1, V).astype(jnp.float32)
    tgt = jnp.reshape(target, (-1,)).astype(jnp.int32)
    logp = jax.nn.log_softmax(logits, axis=1)
    conf = 1.0 - smoothing
    low = smoothing / (V - 1)
    tdist = jnp.where(jax.nn.one_hot(tgt, V, dtype=jnp.bool_), conf, low)
    kl = jnp.where(tdist > 0, tdist * (jnp.log(tdist) - logp), 0.0)
    kl = jnp.where((tgt == pad_token)[:, None], 0.0, kl)
    return jnp.sum(kl) / B


if __name__ == "__main__":
    key = jax.random.PRNGKey(0)
    k1, k2, k3, k4 = jax.random.split(key, 4)

    smoothing = 0.1
    pad_token = 0

    # Case 1: small shapes consistent with the module (B, V, T).
    B, V, T = 2, 32, 8
    output = jax.random.normal(k1, (B, V, T), dtype=jnp.float32)
    target = jax.random.randint(k2, (B, T), 0, V, dtype=jnp.int32)
    loss = jax.block_until_ready(
        label_smooth_loss(output, target,
                          smoothing=smoothing, pad_token=pad_token))
    ref = _reference(output, target, smoothing=smoothing, pad_token=pad_token)
    assert jnp.allclose(loss, ref, rtol=1e-4, atol=1e-4), (loss, ref)

    # Case 2: multiple sequence tiles plus a partial last tile — exercises the
    # lane-index column mask and the resident per-batch accumulator.
    B2, V2, T2 = 2, 32, 200
    output2 = jax.random.normal(k3, (B2, V2, T2), dtype=jnp.float32)
    target2 = jax.random.randint(k4, (B2, T2), 0, V2, dtype=jnp.int32)
    loss2 = jax.block_until_ready(
        label_smooth_loss(output2, target2, smoothing=smoothing,
                          pad_token=pad_token, t_tile=128))
    ref2 = _reference(output2, target2, smoothing=smoothing,
                      pad_token=pad_token)
    assert jnp.allclose(loss2, ref2, rtol=1e-4, atol=1e-4), (loss2, ref2)

    print("KERNEL_OK")
</pallas_src>

<mosaic_0001>
module attributes {stable_mosaic.version = 11 : i64} {
  func.func @_label_smooth_loss_kernel(%arg0: i32, %arg1: i32, %arg2: memref<1x32x8xf32, #tpu.memory_space<vmem>>, %arg3: memref<1x1x8xi32, #tpu.memory_space<vmem>>, %arg4: memref<1x1x8xf32, #tpu.memory_space<vmem>>) attributes {dimension_semantics = [#tpu.dimension_semantics<parallel>, #tpu.dimension_semantics<arbitrary>], iteration_bounds = array<i64: 2, 1>, scalar_prefetch = 0 : i64, scratch_operands = 0 : i64, tpu.core_type = #tpu.core_type<tc>, window_params = [{transform_indices = @transform_0, window_bounds = array<i64: 1, 32, 8>}, {transform_indices = @transform_1, window_bounds = array<i64: 1, 1, 8>}, {transform_indices = @transform_2, window_bounds = array<i64: 1, 1, 8>}]} {
    %c0_i32 = arith.constant 0 : i32
    %0 = arith.cmpi eq, %arg1, %c0_i32 : i32
    %1 = arith.extui %0 : i1 to i32
    %c0_i32_0 = arith.constant 0 : i32
    %2 = arith.cmpi ne, %1, %c0_i32_0 : i32
    scf.if %2 {
      %cst_23 = arith.constant 0.000000e+00 : f32
      %54 = vector.broadcast %cst_23 : f32 to vector<1x8xf32>
      %c0_24 = arith.constant 0 : index
      %c0_25 = arith.constant 0 : index
      %c0_26 = arith.constant 0 : index
      %55 = vector.load %arg4[%c0_24, %c0_25, %c0_26] : memref<1x1x8xf32, #tpu.memory_space<vmem>>, vector<1x1x8xf32>
      %56 = vector.shape_cast %55 : vector<1x1x8xf32> to vector<1x8xf32>
      %57 = vector.shape_cast %54 : vector<1x8xf32> to vector<1x1x8xf32>
      tpu.vector_store %arg4[%c0_24, %c0_25, %c0_26], %57 {strides = array<i32>} : memref<1x1x8xf32, #tpu.memory_space<vmem>>, vector<1x1x8xf32>,
    } else {
    }
    %c0 = arith.constant 0 : index
    %c0_1 = arith.constant 0 : index
    %c0_2 = arith.constant 0 : index
    %3 = vector.load %arg2[%c0, %c0_1, %c0_2] : memref<1x32x8xf32, #tpu.memory_space<vmem>>, vector<1x32x8xf32>
    %4 = vector.shape_cast %3 : vector<1x32x8xf32> to vector<32x8xf32>
    %c0_3 = arith.constant 0 : index
    %c0_4 = arith.constant 0 : index
    %c0_5 = arith.constant 0 : index
    %5 = vector.load %arg3[%c0_3, %c0_4, %c0_5] : memref<1x1x8xi32, #tpu.memory_space<vmem>>, vector<1x1x8xi32>
    %6 = vector.shape_cast %5 : vector<1x1x8xi32> to vector<1x8xi32>
    %cst = arith.constant dense<0xFF800000> : vector<8xf32>
    %7 = vector.multi_reduction <maximumf>, %4, %cst [0] : vector<32x8xf32> to vector<8xf32>
    %8 = vector.shape_cast %7 : vector<8xf32> to vector<1x8xf32>
    %cst_6 = arith.constant dense<0.000000e+00> : vector<8xf32>
    %9 = vector.multi_reduction <add>, %4, %cst_6 [0] : vector<32x8xf32> to vector<8xf32>
    %10 = vector.shape_cast %9 : vector<8xf32> to vector<1x8xf32>
    %11 = vector.broadcast %8 : vector<1x8xf32> to vector<32x8xf32>
    %12 = arith.subf %4, %11 : vector<32x8xf32>
    %13 = math.exp %12 : vector<32x8xf32>
    %cst_7 = arith.constant dense<0.000000e+00> : vector<8xf32>
    %14 = vector.multi_reduction <add>, %13, %cst_7 [0] : vector<32x8xf32> to vector<8xf32>
    %15 = vector.shape_cast %14 : vector<8xf32> to vector<1x8xf32>
    %16 = math.log %15 : vector<1x8xf32>
    %17 = tpu.iota {dimensions = array<i32: 0>} : vector<32x1xi32>
    %18 = vector.broadcast %17 : vector<32x1xi32> to vector<32x8xi32>
    %19 = vector.broadcast %6 : vector<1x8xi32> to vector<32x8xi32>
    %20 = arith.cmpi eq, %18, %19 : vector<32x8xi32>
    %cst_8 = arith.constant 0.000000e+00 : f32
    %21 = vector.broadcast %cst_8 : f32 to vector<32x8xf32>
    %22 = arith.select %20, %4, %21 : vector<32x8xi1>, vector<32x8xf32>
    %cst_9 = arith.constant dense<0.000000e+00> : vector<8xf32>
    %23 = vector.multi_reduction <add>, %22, %cst_9 [0] : vector<32x8xf32> to vector<8xf32>
    %24 = vector.shape_cast %23 : vector<8xf32> to vector<1x8xf32>
    %25 = arith.addf %8, %16 : vector<1x8xf32>
    %cst_10 = arith.constant 3.200000e+01 : f32
    %26 = vector.broadcast %cst_10 : f32 to vector<1x8xf32>
    %27 = arith.mulf %26, %25 : vector<1x8xf32>
    %28 = arith.subf %10, %27 : vector<1x8xf32>
    %29 = arith.subf %24, %8 : vector<1x8xf32>
    %30 = arith.subf %29, %16 : vector<1x8xf32>
    %cst_11 = arith.constant 0.896774172 : f32
    %31 = vector.broadcast %cst_11 : f32 to vector<1x8xf32>
    %32 = arith.mulf %31, %30 : vector<1x8xf32>
    %cst_12 = arith.constant -0.668481708 : f32
    %33 = vector.broadcast %cst_12 : f32 to vector<1x8xf32>
    %34 = arith.subf %33, %32 : vector<1x8xf32>
    %cst_13 = arith.constant 0.0032258064 : f32
    %35 = vector.broadcast %cst_13 : f32 to vector<1x8xf32>
    %36 = arith.mulf %35, %28 : vector<1x8xf32>
    %37 = arith.subf %34, %36 : vector<1x8xf32>
    %38 = tpu.iota {dimensions = array<i32: 1>} : vector<1x8xi32>
    %c8_i32 = arith.constant 8 : i32
    %39 = arith.muli %arg1, %c8_i32 : i32
    %c8_i32_14 = arith.constant 8 : i32
    %40 = arith.subi %c8_i32_14, %39 : i32
    %41 = vector.broadcast %40 : i32 to vector<1x8xi32>
    %42 = arith.cmpi slt, %38, %41 : vector<1x8xi32>
    %c0_i32_15 = arith.constant 0 : i32
    %43 = vector.broadcast %c0_i32_15 : i32 to vector<1x8xi32>
    %44 = arith.cmpi ne, %6, %43 : vector<1x8xi32>
    %45 = arith.andi %42, %44 : vector<1x8xi1>
    %c0_16 = arith.constant 0 : index
    %c0_17 = arith.constant 0 : index
    %c0_18 = arith.constant 0 : index
    %46 = vector.load %arg4[%c0_16, %c0_17, %c0_18] : memref<1x1x8xf32, #tpu.memory_space<vmem>>, vector<1x1x8xf32>
    %47 = vector.shape_cast %46 : vector<1x1x8xf32> to vector<1x8xf32>
    %cst_19 = arith.constant 0.000000e+00 : f32
    %48 = vector.broadcast %cst_19 : f32 to vector<1x8xf32>
    %49 = arith.select %45, %37, %48 : vector<1x8xi1>, vector<1x8xf32>
    %50 = arith.addf %47, %49 : vector<1x8xf32>
    %c0_20 = arith.constant 0 : index
    %c0_21 = arith.constant 0 : index
    %c0_22 = arith.constant 0 : index
    %51 = vector.load %arg4[%c0_20, %c0_21, %c0_22] : memref<1x1x8xf32, #tpu.memory_space<vmem>>, vector<1x1x8xf32>
    %52 = vector.shape_cast %51 : vector<1x1x8xf32> to vector<1x8xf32>
    %53 = vector.shape_cast %50 : vector<1x8xf32> to vector<1x1x8xf32>
    tpu.vector_store %arg4[%c0_20, %c0_21, %c0_22], %53 {strides = array<i32>} : memref<1x1x8xf32, #tpu.memory_space<vmem>>, vector<1x1x8xf32>,
    return
  }
  func.func @transform_0(%arg0: i32, %arg1: i32) -> (i32, i32, i32) {
    %c0_i32 = arith.constant 0 : i32
    %c0_i32_0 = arith.constant 0 : i32
    return %arg0, %c0_i32, %arg1 : i32, i32, i32
  }
  func.func @transform_1(%arg0: i32, %arg1: i32) -> (i32, i32, i32) {
    %c0_i32 = arith.constant 0 : i32
    %c0_i32_0 = arith.constant 0 : i32
    return %arg0, %c0_i32, %arg1 : i32, i32, i32
  }
  func.func @transform_2(%arg0: i32, %arg1: i32) -> (i32, i32, i32) {
    %c0_i32 = arith.constant 0 : i32
    %c0_i32_0 = arith.constant 0 : i32
    %c0_i32_1 = arith.constant 0 : i32
    return %arg0, %c0_i32, %c0_i32_0 : i32, i32, i32
  }
}

</mosaic_0001>

<bundles_post_ra>
// kernel: tpu_custom_call.1
= control target key start
LH: loop header
LB: loop body
LE: loop exit
PB: predicated region body
PF: predicated region fallthrough
CT: control target
= control target key end

     0   :  { %7 = vsyncpa [#allocation3], 0  ;;  %s737_s0 = inlined_call_operand.vmem [shape: f32[2,32,8], index: 0, kind: input, shape index: {}]   ;;  %s738_s1 = inlined_call_operand.vmem [shape: s32[2,1,8], index: 1, kind: input, shape index: {}]   ;;  %s739_s2 = inlined_call_operand.hbm [shape: f32[2,1,8], index: 2, kind: output, shape index: {}]  }
   0x1   :  { %9 = vsyncpa [#allocation3 + $0x1], 0  ;;  %s574_s9 = smov 0   ;;  %s576_s10 = smov 0  }
   0x2   :  { %s578_s11 = smov 0   ;;  %s580_s12 = smov 0  }
   0x3   :  { %s582_s13 = smov 0   ;;  %s584_s14 = smov 0  }
   0x4 LB: > { %s400_s15 = sadd.s32 4294967295, %s555_s14   ;;  %s401_s16 = sadd.s32 4294967294, %s555_s14   ;;  %s555_s14 = sphi %s584_s14, %s15_s14   ;;  %s551_s13 = sphi %s582_s13, %s746_s13   ;;  %s547_s12 = sphi %s580_s12, %s745_s12   ;;  %s543_s11 = sphi %s578_s11, %s744_s11   ;;  %s539_s10 = sphi %s576_s10, %s743_s10   ;;  %s535_s9 = sphi %s574_s9, %s742_s9  }
   0x5   : > { %s27_s17 = sadd.s32 1, %s551_s13  ;;  %s90_s18 = sadd.s32 1, %s543_s11 }
   0x6   : > { %p29_p0 = scmp.ge.s32.totalorder %s27_s17, 2  ;;  %p100_p1 = scmp.ne.s32.totalorder %s543_s11, %s539_s10 }
   0x7   : > { %p101_p2 = scmp.eq.s32.totalorder %s400_s15, 1  ;;  %p106_p3 = scmp.ne.s32.totalorder %s539_s10, %s535_s9 }
   0x8   : > { %s748_s17 = smov (%p29_p0, %s27_s17), 0  ;;  %p107_p5 = scmp.eq.s32.totalorder %s401_s16, 1 }
   0x9   : > { %p614_p4 = por %p101_p2, %p100_p1  ;;  %s87_s20 = ssub.s32 %s551_s13, %s748_s17 }
   0xa   : > { %p404_p6 = scmp.ge.s32.totalorder %s555_s14, 1  ;;  %p88_p7 = scmp.eq.s32.totalorder %s87_s20, 0 }
   0xb   : > { %p621_p8 = por %p107_p5, %p106_p3  ;;  %p145_p9 = scmp.lt.s32.totalorder %s555_s14, 3 }
   0xc   : > { %s627_s22 = scalar_select %p88_p7, %s543_s11, %s90_s18  }
   0xd   : > { %p146_p10 = pnand %p404_p6, %p145_p9 }
   0xe   : > { %s173_s23 = sand.u32 (!%p146_p10), 1, %s539_s10   ;;  %vm193_vm0 = vcmask (!%p146_p10), 57344   ;;  %p175_p11 = scmp.lt.s32.totalorder (!%p146_p10), %s547_s12, 1  ;;  %v557_v0 = vmov (!%p146_p10), 0.0   ;;  %vm200_vm1 = vcmask (!%p146_p10), 64512   ;;  %v254_v8 = vlaneseq (!%p146_p10) }
   0xf   : > { %149 = sbr.rel (%p146_p10) target bundleno = 120 (0x78), region = 28  ;;  %s633_s24 = scalar_lea.vmem (!%p146_p10), [#allocation2], %s173_s23 }
  0x10   : > { %194 = vst.msk [vmem:[%s633_s24] sm:$0x1] (!%p146_p10), %vm193_vm0, %v557_v0  ;;  %v255_v13 = vshrl.u32 (!%p146_p10), %v254_v8, 7  ;;  %s407_s5 = sshll.u32 (!%p146_p10), %s547_s12, 4  ;;  %s319_s6 = sshll.u32 (!%p146_p10), %s633_s24, 4  ;;  %s688_s6 = int_to_ptr.vmem [resolvable:$true] %s319_s6 }
  0x11   : > { %s686_s15 = scalar_lea.hbm (!%p146_p10), %s739_s2, %s407_s5  ;;  %s307_s16 = scalar_lea.sflag (!%p146_p10), [#allocation3], %s173_s23 }
  0x12   : > { %v261_v16 = vsub.s32 (!%p146_p10), 0, %v255_v13  ;;  %v256_v20 = vadd.s32 (!%p146_p10), 8, %v255_v13  ;;  %v257_v24 = vadd.s32 (!%p146_p10), 16, %v255_v13  ;;  %v258_v35 = vadd.s32 (!%p146_p10), 24, %v255_v13  ;;  %s477_s18 = scalar_lea.vmem (!%p146_p10), %s688_s6, 16 }
  0x13   : > { %p478_p12 = scmp.ne.s32.totalorder (!%p146_p10), %s688_s6, %s477_s18 }
  0x15   : > { %p479_p13 = pnand (!%p146_p10), %p478_p12, %p614_p4 }
  0x16   : > { %s176_s25 = scalar_select %p175_p11, %s547_s12, 1 }
  0x17   : > { %p480_p0 = pneg %p479_p13  ;;  %s558_s12 = smov [#allocation2]  }
  0x18   : > { %s410_s26 = sshll.u32 %s176_s25, 5  ;;  %s188_s4 = scalar_lea.vmem %s738_s1, %s176_s25 }
  0x19   : > { %s182_s29 = scalar_lea.vmem %s737_s0, %s410_s26  ;;  %v652_v17 = vld [vmem:[%s188_s4] sm:$0x1]  ;;  %s481_s20 = sshll.u32 %s558_s12, 4  ;;  %s482_s20 = int_to_ptr.vmem [resolvable:$false] %s481_s20 }
  0x1a   : > { %v195_v1 = vld [vmem:[%s182_s29] sm:$0xff]  ;;  %v196_v2 = vld [vmem:[%s182_s29 + $0x8] sm:$0xff]  ;;  %v197_v3 = vld [vmem:[%s182_s29 + $0x10] sm:$0xff]  ;;  %v262_v21 = vrot.slane %v652_v17, %v261_v16  ;;  %vm299_vm7 = vcmp.ne.s32.totalorder %v652_v17, 0  ;;  %s483_s25 = scalar_lea.vmem %s482_s20, 32  ;;  %p484_p1 = scmp.lt.s32.totalorder %s688_s6, %s482_s20 }
  0x1b   : > { %v641_v4 = vld [vmem:[%s182_s29 + $0x18] sm:$0xff]  ;;  %v201_v5 = vsel %vm200_vm1, %v195_v1, -inf  ;;  %v202_v6 = vsel %vm200_vm1, %v196_v2, -inf  ;;  %v203_v7 = vsel %vm200_vm1, %v197_v3, -inf  ;;  %v214_v43 = vsel %vm200_vm1, %v195_v1, 0.0  ;;  %p485_p2 = scmp.lt.s32.totalorder %s483_s25, %s477_s18 }
  0x1c   : > { %v204_v9 = vsel %vm200_vm1, %v641_v4, -inf  ;;  %v205_v10 = vmax.f32 %v201_v5, %v202_v6  ;;  %vm263_vm2 = vcmp.eq.s32.totalorder %v255_v13, %v262_v21  ;;  %vm264_vm3 = vcmp.eq.s32.totalorder %v256_v20, %v262_v21 }
  0x1d   : > { %v206_v11 = vmax.f32 %v203_v7, %v204_v9  ;;  %v267_v29 = vsel %vm263_vm2, %v195_v1, 0.0  ;;  %v268_v30 = vsel %vm264_vm3, %v196_v2, 0.0  ;;  %vm265_vm4 = vcmp.eq.s32.totalorder %v257_v24, %v262_v21  ;;  %p486_p3 = por %p485_p2, %p484_p1 }
  0x1e   : > { %v271_v36 = vsel %vm200_vm1, %v267_v29, 0.0  ;;  %v272_v37 = vsel %vm200_vm1, %v268_v30, 0.0  ;;  %v269_v38 = vsel %vm265_vm4, %v197_v3, 0.0  ;;  %vm266_vm5 = vcmp.eq.s32.totalorder %v258_v35, %v262_v21 }
  0x1f   : > { %v207_v12 = vmax.f32 %v205_v10, %v206_v11  ;;  %v273_v39 = vadd.f32 %v272_v37, %v271_v36  ;;  %v274_v40 = vsel %vm200_vm1, %v269_v38, 0.0  ;;  %v270_v41 = vsel %vm266_vm5, %v641_v4, 0.0  ;;  %p487_p5 = pnand %p486_p3, %p480_p0 }
  0x20   : > { %v215_v44 = vsel %vm200_vm1, %v196_v2, 0.0  ;;  %v276_v45 = vsel %vm200_vm1, %v270_v41, 0.0  ;;  %v217_v54 = vsel %vm200_vm1, %v197_v3, 0.0  ;;  %v219_v61 = vsel %vm200_vm1, %v641_v4, 0.0 }
  0x21   : > { %v208_v14 = vrot.slane %v207_v12, 4  ;;  %v275_v42 = vadd.f32 %v274_v40, %v273_v39  ;;  %v216_v50 = vadd.f32 %v215_v44, %v214_v43 }
  0x23   : > { %v209_v15 = vmax.f32 %v207_v12, %v208_v14  ;;  %v277_v52 = vadd.f32 %v276_v45, %v275_v42  ;;  %v218_v59 = vadd.f32 %v217_v54, %v216_v50 }
  0x25   : > { %v210_v18 = vrot.slane %v209_v15, 2  ;;  %v278_v60 = vrot.slane %v277_v52, 4  ;;  %v220_v0 = vadd.f32 %v219_v61, %v218_v59 }
  0x27   : > { %v211_v19 = vmax.f32 %v209_v15, %v210_v18  ;;  %v221_v6 = vrot.slane %v220_v0, 4 }
  0x29   : > { %v212_v22 = vrot.slane %v211_v19, 1  ;;  %v222_v10 = vadd.f32 %v221_v6, %v220_v0 }
  0x2b   : > { %v655_v23 = vmax.f32 %v211_v19, %v212_v22  ;;  %v223_v13 = vrot.slane %v222_v10, 2 }
  0x2d   : > { %v227_v25 = vsub.f32 %v195_v1, %v655_v23  ;;  %v228_v26 = vsub.f32 %v196_v2, %v655_v23  ;;  %v229_v27 = vsub.f32 %v197_v3, %v655_v23  ;;  %v230_v28 = vsub.f32 %v641_v4, %v655_v23 }
  0x2e   : > { %v279_v1 = vadd.f32 %v278_v60, %v277_v52  ;;  %v224_v15 = vadd.f32 %v223_v13, %v222_v10 }
  0x2f   : > { %v231_v31 = vmul.f32 1.442695, %v227_v25  ;;  %v233_v32 = vmul.f32 1.442695, %v228_v26  ;;  %v235_v33 = vmul.f32 1.442695, %v229_v27 }
  0x30   : > { %v237_v34 = vmul.f32 1.442695, %v230_v28  ;;  %v280_v7 = vrot.slane %v279_v1, 2  ;;  %v225_v18 = vrot.slane %v224_v15, 1  ;;  %v294_v25 = vand.u32 127, %v254_v8 }
  0x31   : > { %467 = vpow2.f32 %v231_v31 }
  0x32   : > { %469 = vpow2.f32 %v233_v32  ;;  %v281_v11 = vadd.f32 %v280_v7, %v279_v1  ;;  %v226_v21 = vadd.f32 %v225_v18, %v224_v15  ;;  %vm298_vm6 = vcmp.lt.s32.totalorder %v294_v25, 8  ;;  %v301_v32 = vld [vmem:[%s633_s24] sm:$0x1] }
  0x33   : > { %471 = vpow2.f32 %v235_v33  ;;  %vm300_vm8 = vmand %vm298_vm6, %vm299_vm7 }
  0x34   : > { %473 = vpow2.f32 %v237_v34  ;;  %v282_v14 = vrot.slane %v281_v11, 1 }
  0x36   : > { %v283_v16 = vadd.f32 %v282_v14, %v281_v11 }
  0x38   : > { %v287_v4 = vsub.f32 %v283_v16, %v655_v23 }
  0x3b   : > { %v468_v46 = vpop.eup %467 }
  0x3c   : > { %v470_v47 = vpop.eup %469  ;;  %v239_v48 = vsel %vm200_vm1, %v468_v46, 0.0 }
  0x3d   : > { %v472_v49 = vpop.eup %471  ;;  %v240_v51 = vsel %vm200_vm1, %v470_v47, 0.0 }
  0x3e   : > { %v474_v53 = vpop.eup %473  ;;  %v241_v55 = vadd.f32 %v240_v51, %v239_v48  ;;  %v242_v56 = vsel %vm200_vm1, %v472_v49, 0.0 }
  0x3f   : > { %v244_v57 = vsel %vm200_vm1, %v474_v53, 0.0 }
  0x40   : > { %v243_v58 = vadd.f32 %v242_v56, %v241_v55 }
  0x42   : > { %v245_v62 = vadd.f32 %v244_v57, %v243_v58 }
  0x44   : > { %v246_v63 = vrot.slane %v245_v62, 4 }
  0x46   : > { %v247_v2 = vadd.f32 %v246_v63, %v245_v62 }
  0x48   : > { %v248_v5 = vrot.slane %v247_v2, 2 }
  0x4a   : > { %v249_v3 = vadd.f32 %v248_v5, %v247_v2 }
  0x4c   : > { %v250_v9 = vrot.slane %v249_v3, 1 }
  0x4e   : > { %v251_v12 = vadd.f32 %v250_v9, %v249_v3 }
  0x50   : > { %475 = vlog2.f32 %v251_v12 }
  0x5a   : > { %v476_v19 = vpop.eup %475 }
  0x5b   : > { %v253_v20 = vmul.f32 0.6931472, %v476_v19 }
  0x5d   : > { %v284_v22 = vadd.f32 %v253_v20, %v655_v23  ;;  %v288_v24 = vsub.f32 %v287_v4, %v253_v20 }
  0x5f   : > { %v285_v26 = vmul.f32 32.0, %v284_v22  ;;  %v289_v27 = vmul.f32 0.8967742, %v288_v24 }
  0x61   : > { %v286_v28 = vsub.f32 %v226_v21, %v285_v26  ;;  %v290_v29 = vsub.f32 -0.6684817, %v289_v27 }
  0x63   : > { %v291_v30 = vmul.f32 0.0032258064, %v286_v28 }
  0x65   : > { %v292_v31 = vsub.f32 %v290_v29, %v291_v30 }
  0x67   : > { %v302_v23 = vsel %vm300_vm8, %v292_v31, 0.0 }
  0x68   : > { %v303_v33 = vadd.f32 %v302_v23, %v301_v32 }
  0x6a   : > { %305 = vst.msk [vmem:[%s633_s24] sm:$0x1] %vm193_vm0, %v303_v33 }
  0x6b   : > { %490 = shalt.err (!%p487_p5)
}
  0x6c   : > { %s491_s23 = scalar_lea.hbm %s686_s15, 16  ;;  %s495_s27 = scalar_lea.hbm %s739_s2, 32 }
  0x6d   : > { %p492_p6 = scmp.ne.s32.totalorder %s686_s15, %s491_s23  ;;  %p496_p10 = scmp.lt.u32.totalorder %s686_s15, %s739_s2 }
  0x6e   : > { %p497_p11 = scmp.lt.u32.totalorder %s495_s27, %s491_s23  ;;  %p499_p13 = scmp.lt.u32.totalorder %s491_s23, %s686_s15 }
  0x6f   : > { %p493_p7 = pnand %p492_p6, %p614_p4 }
  0x70   : > { %p498_p12 = por %p497_p11, %p496_p10 }
  0x71   : > { %p494_p9 = pneg %p493_p7 }
  0x72   : > { %p500_p0 = por %p499_p13, %p498_p12 }
  0x74   : > { %p501_p1 = pnand %p500_p0, %p494_p9 }
  0x76   : > { %504 = shalt.err (!%p501_p1)
}
  0x77   : > { %411 = dma.vmem_to_hbm [thread:$0]  (%p614_p4), %s688_s6, 16, %s686_s15, %s307_s16  }
  0x78 PF: > { %p417_p2 = scmp.ge.s32.totalorder %s555_s14, 2  ;;  %s331_s30 = sand.u32 1, %s535_s9  }
  0x79   : > { %s332_s3 = scalar_lea.sflag [#allocation3], %s331_s30 }
  0x7a   : > { %p414_p3 = pnand %p417_p2, %p621_p8 }
  0x7c   : > { %530 = dma.done.wait (!%p414_p3), %s332_s3, 16  }
  0x7d   : > { %532 = vsyncadd (!%p414_p3), %s332_s3, 4294967280  ;;  %s15_s14 = sadd.s32 1, %s555_s14   ;;  %s742_s9 = smov %s539_s10 }
  0x7e   : > { %p12_p5 = scmp.ge.s32.totalorder %s15_s14, 4   ;;  %s743_s10 = smov %s543_s11 }
  0x7f   : > { %s744_s11 = smov %s627_s22  ;;  %s745_s12 = smov %s551_s13 }
  0x80   : > { %s746_s13 = smov %s748_s17  ;;  %14 = sbr.rel (!%p12_p5) target bundleno = 4 (0x4), region = 70 }
  0x87   :  { %336 = vsyncpa [#allocation3], 1 }
  0x88   :  { %338 = vsyncpa [#allocation3 + $0x1], 1 }

</bundles_post_ra>
